<compile_context>
chip_gen: v6e
topology: v6e:2x2x1
jax: 0.10.0
libtpu: 0.0.40
codegen_flags: <defaults>
</compile_context>

<pallas_src>
import jax
import jax.numpy as jnp
from jax import lax
from jax.experimental import pallas as pl
from jax.experimental.pallas import tpu as pltpu

DOT_DTYPE = jnp.bfloat16          # MXU input dtype; accumulation is always f32


def _round_up(x, m):
    return ((x + m - 1) // m) * m


def _tpu_vmem_bytes():
    try:
        return int(pltpu.get_tpu_info().vmem_capacity_bytes)
    except Exception:
        return 128 * 1024 * 1024


def _is_v5e():
    try:
        kind = jax.devices()[0].device_kind.lower()
        return ("v5 lite" in kind) or ("v5e" in kind) or ("v5litepod" in kind)
    except Exception:
        return False


def _choose_batch_tile(batch, seq, hidden):
    """Batch-tile size: multiple of 8 sublanes, VMEM- and generation-aware."""
    vmem_cap = _tpu_vmem_bytes()
    # per-buffer budget for the (tb*S, H) bf16 token block (double-buffered by
    # the BlockSpec pipeline); smaller on 64 MiB-VMEM chips (v7x).
    budget = (3 if vmem_cap <= 64 * 1024 * 1024 else 6) * 1024 * 1024
    tb = budget // max(2 * seq * hidden, 1)           # bf16 bytes per token row
    tb = min(tb, max(1, 2048 // max(seq, 1)))          # cap pooling-selector width
    tb = min(tb, 64 if _is_v5e() else 128)             # v5e is MXU-bound: smaller tile
    tb = min(tb, _round_up(batch, 8))
    tb = max(8, (tb // 8) * 8)
    # v7x has 2 TensorCores sharing the "parallel" grid axis: keep >= 2 steps.
    if batch > 8:
        tb = min(tb, max(8, _round_up((batch + 1) // 2, 8)))
    return tb


def _vmem_limit_bytes():
    vmem_cap = _tpu_vmem_bytes()
    return 48 * 1024 * 1024 if vmem_cap <= 64 * 1024 * 1024 else 64 * 1024 * 1024


# ----------------------------------------------------------------------------
# Pallas kernels
# ----------------------------------------------------------------------------
def _tower_kernel(x_ref, sel_ref, m_ref, inv_ref,
                  w_enc_ref, b_enc_ref, g_ref, bt_ref,
                  w_head_ref, b_head_ref,
                  cls_ref, head_ref):
    """One batch tile: encoder -> masked mean pool (MXU) -> fused VAE head."""
    # --- encoder: dense (bf16 MXU, f32 acc) + GELU + LayerNorm (f32) ---
    h = jnp.dot(x_ref[...], w_enc_ref[...],
                preferred_element_type=jnp.float32)          # (TB*S, H) f32
    h = h + b_enc_ref[...]
    # TODO(synk): torch nn.GELU defaults to the exact erf form; this is the
    # tanh approximation (small numerical drift vs the reference).
    h = jax.nn.gelu(h, approximate=True)

    mu = jnp.mean(h, axis=-1, keepdims=True)
    var = jnp.mean((h - mu) * (h - mu), axis=-1, keepdims=True)
    h = (h - mu) * lax.rsqrt(var + 1e-5)
    hb = (h * g_ref[...] + bt_ref[...]).astype(DOT_DTYPE)    # (TB*S, H) bf16

    # --- masked mean pooling on the MXU ---
    # pooled[b] = sum_s mask[b, s] * h[b, s] via the precomputed block-diagonal
    # selector (grid-invariant) times the per-tile lane-dense mask row.
    sel_m = sel_ref[...] * m_ref[0]                          # (TB, TB*S) bf16
    pooled = jnp.dot(sel_m, hb,
                     preferred_element_type=jnp.float32)     # (TB, H) f32
    cls = pooled * inv_ref[...]                              # exact 1/count (f32)
    cls_ref[...] = cls

    # --- fused, lane-padded VAE head: one (H, 2*Ep) matmul -> [mean|log_std] ---
    head_ref[...] = (jnp.dot(cls.astype(DOT_DTYPE), w_head_ref[...],
                             preferred_element_type=jnp.float32)
                     + b_head_ref[...])


def _cls_to_embedding_kernel(cls_ref, w_mu_ref, b_mu_ref, emb_ref):
    """cls -> embedding (the `cls_to_embedding` path of VAEItemTower)."""
    emb_ref[...] = (jnp.dot(cls_ref[...].astype(DOT_DTYPE), w_mu_ref[...],
                            preferred_element_type=jnp.float32)
                    + b_mu_ref[...])


# ----------------------------------------------------------------------------
# pallas_call wrappers
# ----------------------------------------------------------------------------
def _run_tower(kp, x_emb, attn_mask, emb_dim, emb_pad):
    """x_emb: (B, S, H) bf16 tokens, attn_mask: (B, S) f32. Returns cls, mean, log_std."""
    B, S, H = x_emb.shape
    tb = _choose_batch_tile(B, S, H)
    B_pad = _round_up(B, tb)
    pad = B_pad - B
    if pad:
        x_emb = jnp.pad(x_emb, ((0, pad), (0, 0), (0, 0)))
        attn_mask = jnp.pad(attn_mask, ((0, pad), (0, 0)))
    num_tiles = B_pad // tb
    rows = tb * S

    x_flat = x_emb.reshape(B_pad * S, H)                                 # bf16
    mask_rows = attn_mask.astype(DOT_DTYPE).reshape(num_tiles, 1, rows)  # 0/1 exact
    inv_denom = (1.0 / jnp.maximum(attn_mask.sum(-1, keepdims=True), 1.0)
                 ).astype(jnp.float32)                                   # (B_pad, 1)

    # Grid-invariant block-diagonal pooling selector, built once in the wrapper
    # and passed with a constant index_map (DMA'd once, resident in VMEM).
    sel = jnp.repeat(jnp.eye(tb, dtype=jnp.float32), S, axis=1).astype(DOT_DTYPE)

    cls_pad, head_pad = pl.pallas_call(
        _tower_kernel,
        grid=(num_tiles,),
        in_specs=[
            pl.BlockSpec((rows, H), lambda b: (b, 0)),          # bf16 tokens
            pl.BlockSpec((tb, rows), lambda b: (0, 0)),         # pooling selector
            pl.BlockSpec((1, 1, rows), lambda b: (b, 0, 0)),    # lane-dense mask row
            pl.BlockSpec((tb, 1), lambda b: (b, 0)),            # exact 1/count
            pl.BlockSpec((H, H), lambda b: (0, 0)),             # w_enc (bf16)
            pl.BlockSpec((1, H), lambda b: (0, 0)),             # b_enc
            pl.BlockSpec((1, H), lambda b: (0, 0)),             # LN gamma
            pl.BlockSpec((1, H), lambda b: (0, 0)),             # LN beta
            pl.BlockSpec((H, 2 * emb_pad), lambda b: (0, 0)),   # w_head (bf16, padded)
            pl.BlockSpec((1, 2 * emb_pad), lambda b: (0, 0)),   # b_head (padded)
        ],
        out_specs=(
            pl.BlockSpec((tb, H), lambda b: (b, 0)),            # cls
            pl.BlockSpec((tb, 2 * emb_pad), lambda b: (b, 0)),  # [mean | log_std]
        ),
        out_shape=(
            jax.ShapeDtypeStruct((B_pad, H), jnp.float32),
            jax.ShapeDtypeStruct((B_pad, 2 * emb_pad), jnp.float32),
        ),
        compiler_params=pltpu.CompilerParams(
            dimension_semantics=("parallel",),
            vmem_limit_bytes=_vmem_limit_bytes()),
    )(x_flat, sel, mask_rows, inv_denom,
      kp["w_enc"], kp["b_enc"], kp["gamma"], kp["beta"],
      kp["w_head"], kp["b_head"])

    cls = cls_pad[:B]
    mean = head_pad[:B, :emb_dim]
    log_std = head_pad[:B, emb_pad:emb_pad + emb_dim]
    return cls, mean, log_std


def _run_cls_to_embedding(kp, cls):
    B, H = cls.shape
    E = kp["b_mu"].shape[-1]
    tb = max(8, min(256, _round_up(B, 8)))
    B_pad = _round_up(B, tb)
    if B_pad != B:
        cls = jnp.pad(cls, ((0, B_pad - B), (0, 0)))
    emb = pl.pallas_call(
        _cls_to_embedding_kernel,
        grid=(B_pad // tb,),
        in_specs=[pl.BlockSpec((tb, H), lambda b: (b, 0)),
                  pl.BlockSpec((H, E), lambda b: (0, 0)),
                  pl.BlockSpec((1, E), lambda b: (0, 0))],
        out_specs=pl.BlockSpec((tb, E), lambda b: (b, 0)),
        out_shape=jax.ShapeDtypeStruct((B_pad, E), jnp.float32),
        compiler_params=pltpu.CompilerParams(
            dimension_semantics=("parallel",),
            vmem_limit_bytes=_vmem_limit_bytes()),
    )(cls.astype(jnp.float32), kp["w_mu"], kp["b_mu"])
    return emb[:B]


# ----------------------------------------------------------------------------
# VAEItemTower equivalent (dispatch semantics of the PyTorch forward)
# ----------------------------------------------------------------------------
class VAEItemTowerPallas:
    def __init__(self, params, emb_table, sample_param=0.0, noise_key=None):
        H = params["w_enc"].shape[0]
        E = params["b_mu"].shape[-1]
        Ep = _round_up(E, 128)                 # lane-aligned head sections
        self.H, self.E, self.Ep = H, E, Ep

        # bf16 token table: halves the dominant token DMA stream.
        self.emb_table = jnp.asarray(emb_table, DOT_DTYPE)

        # Kernel-ready weights cached once: fused [w_mu | w_ls] head, with each
        # section zero-padded to a 128-lane boundary for lane-dense stores.
        w_head = jnp.zeros((H, 2 * Ep), jnp.float32)
        w_head = w_head.at[:, :E].set(jnp.asarray(params["w_mu"], jnp.float32))
        w_head = w_head.at[:, Ep:Ep + E].set(jnp.asarray(params["w_ls"], jnp.float32))
        b_head = jnp.zeros((1, 2 * Ep), jnp.float32)
        b_head = b_head.at[:, :E].set(jnp.asarray(params["b_mu"], jnp.float32).reshape(1, E))
        b_head = b_head.at[:, Ep:Ep + E].set(jnp.asarray(params["b_ls"], jnp.float32).reshape(1, E))

        self.kparams = dict(
            w_enc=jnp.asarray(params["w_enc"], DOT_DTYPE),
            b_enc=jnp.asarray(params["b_enc"], jnp.float32).reshape(1, H),
            gamma=jnp.asarray(params["gamma"], jnp.float32).reshape(1, H),
            beta=jnp.asarray(params["beta"], jnp.float32).reshape(1, H),
            w_head=w_head.astype(DOT_DTYPE),
            b_head=b_head,
            w_mu=jnp.asarray(params["w_mu"], DOT_DTYPE),
            b_mu=jnp.asarray(params["b_mu"], jnp.float32).reshape(1, E),
        )
        self.sample_param = sample_param
        self._noise_key = noise_key if noise_key is not None else jax.random.PRNGKey(42)

    def get_sample_param(self):
        return self.sample_param

    def set_sample_param(self, sample):
        # NOTE: sample_param is a trace-time constant; changing it retraces.
        self.sample_param = sample

    def cls_to_embedding(self, cls):
        return _run_cls_to_embedding(self.kparams, cls)

    def forward(self, cls=None, text=None, input_step="inputs",
                output_step="embedding", **inputs):
        if input_step == "text":
            # TODO(synk): tokenizer (text -> inputs) has no Pallas equivalent;
            # feed tokenized `input_ids` / `attention_mask` directly.
            raise NotImplementedError("text input requires a tokenizer")
        if input_step == "inputs":
            input_ids = inputs["input_ids"]
            B, S = input_ids.shape
            attn = jnp.asarray(
                inputs.get("attention_mask", jnp.ones((B, S), jnp.float32)),
                jnp.float32)
            x_emb = self.emb_table[input_ids]        # bf16 gather glue (plain JAX)

            cls_o, mean, log_std = _run_tower(self.kparams, x_emb, attn,
                                              self.E, self.Ep)
            if output_step == "cls":
                return cls_o
            if output_step == "mean":
                return mean

            if output_step in ("embedding", "dict", "return_mean_std"):
                sample = float(self.sample_param)
                std = jnp.exp(log_std)               # tiny (B, E), done in wrapper
                if sample != 0.0:
                    eps = inputs.get("noise")
                    if eps is None:
                        self._noise_key, sub = jax.random.split(self._noise_key)
                        eps = jax.random.normal(sub, mean.shape, jnp.float32)
                    emb = mean + sample * std * eps
                else:
                    emb = mean                       # deterministic path
                if output_step == "embedding":
                    return emb
                if output_step == "dict":
                    return {"cls": cls_o, "mean": mean, "std": std,
                            "embedding": emb}
                if output_step == "return_mean_std":
                    return mean, std
        elif input_step == "cls":
            if output_step == "embedding":
                return self.cls_to_embedding(cls)
        raise NotImplementedError(
            f"{self.__class__.__name__} does not support "
            f"{input_step}->{output_step} forward")

    __call__ = forward


# ----------------------------------------------------------------------------
# main
# ----------------------------------------------------------------------------
if __name__ == "__main__":
    B, S, H, E, V = 2, 8, 32, 16, 100

    key = jax.random.PRNGKey(0)
    k = jax.random.split(key, 6)

    emb_table = jax.random.normal(k[0], (V, H), jnp.float32) * 0.02
    params = dict(
        w_enc=jax.random.normal(k[1], (H, H), jnp.float32) * 0.02,
        b_enc=jnp.zeros((1, H), jnp.float32),
        gamma=jnp.ones((1, H), jnp.float32),
        beta=jnp.zeros((1, H), jnp.float32),
        w_mu=jax.random.normal(k[2], (H, E), jnp.float32) * 0.02,
        b_mu=jnp.zeros((1, E), jnp.float32),
        w_ls=jax.random.normal(k[3], (H, E), jnp.float32) * 0.02,
        b_ls=jnp.full((1, E), -1.0, jnp.float32),
    )

    input_ids = jax.random.randint(k[4], (B, S), 0, V)
    attention_mask = jnp.ones((B, S), jnp.float32).at[1, 6:].set(0.0)

    tower = VAEItemTowerPallas(params, emb_table, sample_param=0.0)

    emb = tower(input_ids=input_ids, attention_mask=attention_mask,
                input_step="inputs", output_step="embedding")
    out_dict = tower(input_ids=input_ids, attention_mask=attention_mask,
                     input_step="inputs", output_step="dict")
    mean, std = tower(input_ids=input_ids, attention_mask=attention_mask,
                      input_step="inputs", output_step="return_mean_std")
    emb_from_cls = tower(cls=out_dict["cls"], input_step="cls",
                         output_step="embedding")

    jax.block_until_ready((emb, out_dict, mean, std, emb_from_cls))

    assert emb.shape == (B, E)
    assert out_dict["cls"].shape == (B, H)
    assert mean.shape == (B, E) and std.shape == (B, E)
    assert emb_from_cls.shape == (B, E)
    assert bool(jnp.all(jnp.isfinite(out_dict["cls"])))
    # sample_param == 0 -> embedding is the deterministic VAE mean, and the
    # cls->embedding path must agree with the inputs->embedding path.
    assert jnp.allclose(emb, mean, atol=1e-5)
    assert jnp.allclose(emb, emb_from_cls, atol=1e-5)

    print("KERNEL_OK")
</pallas_src>

<mosaic_0001>
module attributes {stable_mosaic.version = 11 : i64} {
  func.func @_tower_kernel(%arg0: i32, %arg1: memref<64x32xbf16, #tpu.memory_space<vmem>>, %arg2: memref<8x64xbf16, #tpu.memory_space<vmem>>, %arg3: memref<1x1x64xbf16, #tpu.memory_space<vmem>>, %arg4: memref<8x1xf32, #tpu.memory_space<vmem>>, %arg5: memref<32x32xbf16, #tpu.memory_space<vmem>>, %arg6: memref<1x32xf32, #tpu.memory_space<vmem>>, %arg7: memref<1x32xf32, #tpu.memory_space<vmem>>, %arg8: memref<1x32xf32, #tpu.memory_space<vmem>>, %arg9: memref<32x256xbf16, #tpu.memory_space<vmem>>, %arg10: memref<1x256xf32, #tpu.memory_space<vmem>>, %arg11: memref<8x32xf32, #tpu.memory_space<vmem>>, %arg12: memref<8x256xf32, #tpu.memory_space<vmem>>) attributes {dimension_semantics = [#tpu.dimension_semantics<parallel>], iteration_bounds = array<i64: 1>, scalar_prefetch = 0 : i64, scratch_operands = 0 : i64, tpu.core_type = #tpu.core_type<tc>, window_params = [{transform_indices = @transform_0, window_bounds = array<i64: 64, 32>}, {pipeline_mode = #tpu.pipeline_mode<synchronous>, transform_indices = @transform_1, window_bounds = array<i64: 8, 64>}, {transform_indices = @transform_2, window_bounds = array<i64: 1, 1, 64>}, {transform_indices = @transform_3, window_bounds = array<i64: 8, 1>}, {pipeline_mode = #tpu.pipeline_mode<synchronous>, transform_indices = @transform_4, window_bounds = array<i64: 32, 32>}, {pipeline_mode = #tpu.pipeline_mode<synchronous>, transform_indices = @transform_5, window_bounds = array<i64: 1, 32>}, {pipeline_mode = #tpu.pipeline_mode<synchronous>, transform_indices = @transform_6, window_bounds = array<i64: 1, 32>}, {pipeline_mode = #tpu.pipeline_mode<synchronous>, transform_indices = @transform_7, window_bounds = array<i64: 1, 32>}, {pipeline_mode = #tpu.pipeline_mode<synchronous>, transform_indices = @transform_8, window_bounds = array<i64: 32, 256>}, {pipeline_mode = #tpu.pipeline_mode<synchronous>, transform_indices = @transform_9, window_bounds = array<i64: 1, 256>}, {transform_indices = @transform_10, window_bounds = array<i64: 8, 32>}, {transform_indices = @transform_11, window_bounds = array<i64: 8, 256>}]} {
    %c0 = arith.constant 0 : index
    %c0_0 = arith.constant 0 : index
    %0 = vector.load %arg1[%c0, %c0_0] : memref<64x32xbf16, #tpu.memory_space<vmem>>, vector<64x32xbf16>
    %c0_1 = arith.constant 0 : index
    %c0_2 = arith.constant 0 : index
    %1 = vector.load %arg5[%c0_1, %c0_2] : memref<32x32xbf16, #tpu.memory_space<vmem>>, vector<32x32xbf16>
    %cst = arith.constant dense<0.000000e+00> : vector<64x32xf32>
    %2 = tpu.matmul %0, %1, %cst {dimension_numbers = #tpu.dot_dimension_numbers<[1], [0], [0], [1], [0, 0, 1, 1], [], []>} : vector<64x32xbf16>, vector<32x32xbf16>, vector<64x32xf32> -> vector<64x32xf32>
    %c0_3 = arith.constant 0 : index
    %c0_4 = arith.constant 0 : index
    %3 = vector.load %arg6[%c0_3, %c0_4] : memref<1x32xf32, #tpu.memory_space<vmem>>, vector<1x32xf32>
    %4 = vector.broadcast %3 : vector<1x32xf32> to vector<64x32xf32>
    %5 = arith.addf %2, %4 : vector<64x32xf32>
    %6 = arith.mulf %5, %5 : vector<64x32xf32>
    %7 = arith.mulf %5, %6 : vector<64x32xf32>
    %cst_5 = arith.constant 4.471500e-02 : f32
    %8 = vector.broadcast %cst_5 : f32 to vector<64x32xf32>
    %9 = arith.mulf %8, %7 : vector<64x32xf32>
    %10 = arith.addf %5, %9 : vector<64x32xf32>
    %cst_6 = arith.constant 0.797884583 : f32
    %11 = vector.broadcast %cst_6 : f32 to vector<64x32xf32>
    %12 = arith.mulf %11, %10 : vector<64x32xf32>
    %13 = math.tanh %12 : vector<64x32xf32>
    %cst_7 = arith.constant 1.000000e+00 : f32
    %14 = vector.broadcast %cst_7 : f32 to vector<64x32xf32>
    %15 = arith.addf %14, %13 : vector<64x32xf32>
    %cst_8 = arith.constant 5.000000e-01 : f32
    %16 = vector.broadcast %cst_8 : f32 to vector<64x32xf32>
    %17 = arith.mulf %16, %15 : vector<64x32xf32>
    %18 = arith.mulf %5, %17 : vector<64x32xf32>
    %cst_9 = arith.constant dense<0.000000e+00> : vector<64xf32>
    %19 = vector.multi_reduction <add>, %18, %cst_9 [1] : vector<64x32xf32> to vector<64xf32>
    %20 = vector.shape_cast %19 : vector<64xf32> to vector<64x1xf32>
    %cst_10 = arith.constant 3.200000e+01 : f32
    %21 = vector.broadcast %cst_10 : f32 to vector<64x1xf32>
    %22 = arith.divf %20, %21 : vector<64x1xf32>
    %23 = vector.broadcast %22 : vector<64x1xf32> to vector<64x32xf32>
    %24 = arith.subf %18, %23 : vector<64x32xf32>
    %25 = vector.broadcast %22 : vector<64x1xf32> to vector<64x32xf32>
    %26 = arith.subf %18, %25 : vector<64x32xf32>
    %27 = arith.mulf %24, %26 : vector<64x32xf32>
    %cst_11 = arith.constant dense<0.000000e+00> : vector<64xf32>
    %28 = vector.multi_reduction <add>, %27, %cst_11 [1] : vector<64x32xf32> to vector<64xf32>
    %29 = vector.shape_cast %28 : vector<64xf32> to vector<64x1xf32>
    %cst_12 = arith.constant 3.200000e+01 : f32
    %30 = vector.broadcast %cst_12 : f32 to vector<64x1xf32>
    %31 = arith.divf %29, %30 : vector<64x1xf32>
    %32 = vector.broadcast %22 : vector<64x1xf32> to vector<64x32xf32>
    %33 = arith.subf %18, %32 : vector<64x32xf32>
    %cst_13 = arith.constant 9.99999974E-6 : f32
    %34 = vector.broadcast %cst_13 : f32 to vector<64x1xf32>
    %35 = arith.addf %31, %34 : vector<64x1xf32>
    %36 = math.rsqrt %35 : vector<64x1xf32>
    %37 = vector.broadcast %36 : vector<64x1xf32> to vector<64x32xf32>
    %38 = arith.mulf %33, %37 : vector<64x32xf32>
    %c0_14 = arith.constant 0 : index
    %c0_15 = arith.constant 0 : index
    %39 = vector.load %arg7[%c0_14, %c0_15] : memref<1x32xf32, #tpu.memory_space<vmem>>, vector<1x32xf32>
    %40 = vector.broadcast %39 : vector<1x32xf32> to vector<64x32xf32>
    %41 = arith.mulf %38, %40 : vector<64x32xf32>
    %c0_16 = arith.constant 0 : index
    %c0_17 = arith.constant 0 : index
    %42 = vector.load %arg8[%c0_16, %c0_17] : memref<1x32xf32, #tpu.memory_space<vmem>>, vector<1x32xf32>
    %43 = vector.broadcast %42 : vector<1x32xf32> to vector<64x32xf32>
    %44 = arith.addf %41, %43 : vector<64x32xf32>
    %45 = arith.truncf %44 : vector<64x32xf32> to vector<64x32xbf16>
    %c0_18 = arith.constant 0 : index
    %c0_19 = arith.constant 0 : index
    %46 = vector.load %arg2[%c0_18, %c0_19] : memref<8x64xbf16, #tpu.memory_space<vmem>>, vector<8x64xbf16>
    %c0_20 = arith.constant 0 : index
    %c0_21 = arith.constant 0 : index
    %c0_22 = arith.constant 0 : index
    %47 = vector.load %arg3[%c0_20, %c0_21, %c0_22] : memref<1x1x64xbf16, #tpu.memory_space<vmem>>, vector<1x1x64xbf16>
    %48 = vector.shape_cast %47 : vector<1x1x64xbf16> to vector<1x64xbf16>
    %49 = vector.broadcast %48 : vector<1x64xbf16> to vector<8x64xbf16>
    %50 = arith.mulf %46, %49 : vector<8x64xbf16>
    %cst_23 = arith.constant dense<0.000000e+00> : vector<8x32xf32>
    %51 = tpu.matmul %50, %45, %cst_23 {dimension_numbers = #tpu.dot_dimension_numbers<[1], [0], [0], [1], [0, 0, 1, 1], [], []>} : vector<8x64xbf16>, vector<64x32xbf16>, vector<8x32xf32> -> vector<8x32xf32>
    %c0_24 = arith.constant 0 : index
    %c0_25 = arith.constant 0 : index
    %52 = vector.load %arg4[%c0_24, %c0_25] : memref<8x1xf32, #tpu.memory_space<vmem>>, vector<8x1xf32>
    %53 = vector.broadcast %52 : vector<8x1xf32> to vector<8x32xf32>
    %54 = arith.mulf %51, %53 : vector<8x32xf32>
    %c0_26 = arith.constant 0 : index
    %c0_27 = arith.constant 0 : index
    %55 = vector.load %arg11[%c0_26, %c0_27] : memref<8x32xf32, #tpu.memory_space<vmem>>, vector<8x32xf32>
    tpu.vector_store %arg11[%c0_26, %c0_27], %54 {strides = array<i32>} : memref<8x32xf32, #tpu.memory_space<vmem>>, vector<8x32xf32>,
    %56 = arith.truncf %54 : vector<8x32xf32> to vector<8x32xbf16>
    %c0_28 = arith.constant 0 : index
    %c0_29 = arith.constant 0 : index
    %57 = vector.load %arg9[%c0_28, %c0_29] : memref<32x256xbf16, #tpu.memory_space<vmem>>, vector<32x256xbf16>
    %cst_30 = arith.constant dense<0.000000e+00> : vector<8x256xf32>
    %58 = tpu.matmul %56, %57, %cst_30 {dimension_numbers = #tpu.dot_dimension_numbers<[1], [0], [0], [1], [0, 0, 1, 1], [], []>} : vector<8x32xbf16>, vector<32x256xbf16>, vector<8x256xf32> -> vector<8x256xf32>
    %c0_31 = arith.constant 0 : index
    %c0_32 = arith.constant 0 : index
    %59 = vector.load %arg10[%c0_31, %c0_32] : memref<1x256xf32, #tpu.memory_space<vmem>>, vector<1x256xf32>
    %60 = vector.broadcast %59 : vector<1x256xf32> to vector<8x256xf32>
    %61 = arith.addf %58, %60 : vector<8x256xf32>
    %c0_33 = arith.constant 0 : index
    %c0_34 = arith.constant 0 : index
    %62 = vector.load %arg12[%c0_33, %c0_34] : memref<8x256xf32, #tpu.memory_space<vmem>>, vector<8x256xf32>
    tpu.vector_store %arg12[%c0_33, %c0_34], %61 {strides = array<i32>} : memref<8x256xf32, #tpu.memory_space<vmem>>, vector<8x256xf32>,
    return
  }
  func.func @transform_0(%arg0: i32) -> (i32, i32) {
    %c0_i32 = arith.constant 0 : i32
    %c0_i32_0 = arith.constant 0 : i32
    return %arg0, %c0_i32 : i32, i32
  }
  func.func @transform_1(%arg0: i32) -> (i32, i32) {
    %c0_i32 = arith.constant 0 : i32
    %c0_i32_0 = arith.constant 0 : i32
    %c0_i32_1 = arith.constant 0 : i32
    return %c0_i32, %c0_i32_0 : i32, i32
  }
  func.func @transform_2(%arg0: i32) -> (i32, i32, i32) {
    %c0_i32 = arith.constant 0 : i32
    %c0_i32_0 = arith.constant 0 : i32
    %c0_i32_1 = arith.constant 0 : i32
    return %arg0, %c0_i32, %c0_i32_0 : i32, i32, i32
  }
  func.func @transform_3(%arg0: i32) -> (i32, i32) {
    %c0_i32 = arith.constant 0 : i32
    %c0_i32_0 = arith.constant 0 : i32
    return %arg0, %c0_i32 : i32, i32
  }
  func.func @transform_4(%arg0: i32) -> (i32, i32) {
    %c0_i32 = arith.constant 0 : i32
    %c0_i32_0 = arith.constant 0 : i32
    %c0_i32_1 = arith.constant 0 : i32
    return %c0_i32, %c0_i32_0 : i32, i32
  }
  func.func @transform_5(%arg0: i32) -> (i32, i32) {
    %c0_i32 = arith.constant 0 : i32
    %c0_i32_0 = arith.constant 0 : i32
    %c0_i32_1 = arith.constant 0 : i32
    return %c0_i32, %c0_i32_0 : i32, i32
  }
  func.func @transform_6(%arg0: i32) -> (i32, i32) {
    %c0_i32 = arith.constant 0 : i32
    %c0_i32_0 = arith.constant 0 : i32
    %c0_i32_1 = arith.constant 0 : i32
    return %c0_i32, %c0_i32_0 : i32, i32
  }
  func.func @transform_7(%arg0: i32) -> (i32, i32) {
    %c0_i32 = arith.constant 0 : i32
    %c0_i32_0 = arith.constant 0 : i32
    %c0_i32_1 = arith.constant 0 : i32
    return %c0_i32, %c0_i32_0 : i32, i32
  }
  func.func @transform_8(%arg0: i32) -> (i32, i32) {
    %c0_i32 = arith.constant 0 : i32
    %c0_i32_0 = arith.constant 0 : i32
    %c0_i32_1 = arith.constant 0 : i32
    return %c0_i32, %c0_i32_0 : i32, i32
  }
  func.func @transform_9(%arg0: i32) -> (i32, i32) {
    %c0_i32 = arith.constant 0 : i32
    %c0_i32_0 = arith.constant 0 : i32
    %c0_i32_1 = arith.constant 0 : i32
    return %c0_i32, %c0_i32_0 : i32, i32
  }
  func.func @transform_10(%arg0: i32) -> (i32, i32) {
    %c0_i32 = arith.constant 0 : i32
    %c0_i32_0 = arith.constant 0 : i32
    return %arg0, %c0_i32 : i32, i32
  }
  func.func @transform_11(%arg0: i32) -> (i32, i32) {
    %c0_i32 = arith.constant 0 : i32
    %c0_i32_0 = arith.constant 0 : i32
    return %arg0, %c0_i32 : i32, i32
  }
}

</mosaic_0001>

<bundles_post_ra>
// kernel: tpu_custom_call.1
= control target key start
LH: loop header
LB: loop body
LE: loop exit
PB: predicated region body
PF: predicated region fallthrough
CT: control target
= control target key end

     0   :  { %17 = vsyncpa [#allocation3], 0  ;;  %vm91_vm0 = vcmask 261120   ;;  %s918_s0 = inlined_call_operand.vmem [shape: bf16[64,32], index: 0, kind: input, shape index: {}]   ;;  %s919_s1 = inlined_call_operand.vmem [shape: bf16[8,64], index: 1, kind: input, shape index: {}]   ;;  %s920_s2 = inlined_call_operand.vmem [shape: bf16[1,1,64], index: 2, kind: input, shape index: {}]   ;;  %s921_s3 = inlined_call_operand.vmem [shape: f32[8,1], index: 3, kind: input, shape index: {}]   ;;  %s922_s4 = inlined_call_operand.vmem [shape: bf16[32,32], index: 4, kind: input, shape index: {}]   ;;  %s923_s5 = inlined_call_operand.vmem [shape: f32[1,32], index: 5, kind: input, shape index: {}]   ;;  %s924_s6 = inlined_call_operand.vmem [shape: f32[1,32], index: 6, kind: input, shape index: {}]   ;;  %s925_s7 = inlined_call_operand.vmem [shape: f32[1,32], index: 7, kind: input, shape index: {}]   ;;  %s926_s8 = inlined_call_operand.vmem [shape: bf16[32,256], index: 8, kind: input, shape index: {}]   ;;  %s927_s9 = inlined_call_operand.vmem [shape: f32[1,256], index: 9, kind: input, shape index: {}]   ;;  %s928_s10 = inlined_call_operand.hbm [shape: f32[8,32], index: 10, kind: output, shape index: {0}]   ;;  %s929_s11 = inlined_call_operand.hbm [shape: f32[8,256], index: 11, kind: output, shape index: {1}]  }
   0x1   :  { %v613_v0 = vld [vmem:[%s922_s4 + $0x8] sm:$0xff]   ;;  %v614_v1 = vld [vmem:[%s922_s4] sm:$0xff]   ;;  %v617_v4 = vld [vmem:[%s918_s0 + $0x10] sm:$0xff]  }
   0x2   :  { %583 = vmatprep.subr.bf16.mxu0 %v613_v0  ;;  %v615_v2 = vld [vmem:[%s918_s0] sm:$0xff]   ;;  %v616_v3 = vld [vmem:[%s918_s0 + $0x8] sm:$0xff]  }
   0x3   :  { %584 = vmatpush3.bf16.msra.mxu0 %v613_v0  ;;  %587 = vmatprep.mubr.msk.bf16.mxu0 %vm91_vm0, %v615_v2 }
   0x4   :  { %585 = vmatprep.subr.bf16.mxu0 %v614_v1 }
   0x7   :  { %586 = vmatpush3.bf16.msra.mxu0 %v614_v1 }
   0x8   :  { %18 = vsyncpa [#allocation5], 0  ;;  %v618_v5 = vld [vmem:[%s918_s0 + $0x18] sm:$0xff]   ;;  %v553_v6 = vld [vmem:[%s923_s5] ss:$0 sm:$0xff]  ;;  %vm702_vm1 = vmmov 0  }
   0x9   :  { %vm390_vm2 = vcmask 523264   ;;  %s704_s22 = smov [#allocation2]  }
   0xa   :  { %588 = vmatmul.mubr.msk.bf16.vlgmr.msra.gmra.mxu0 %vm91_vm0, %v616_v3 }
   0xb   :  { %591 = vmatprep.mubr.msk.bf16.mxu0 %vm91_vm0, %v617_v4 }
  0x12   :  { %592 = vmatmul.mubr.msk.bf16.gmra.mxu0 %vm91_vm0, %v618_v5 }
  0xca   :  { %v589_v7 = vpop.f32.mrf.mxu0 }
  0xcb   :  { %v791_v8 = vadd.f32 %v589_v7, %v553_v6 }
  0xcc   :  { %v138_v9 = vpop.f32.mrf.mxu0 }
  0xcd   :  { %v171_v10 = vmul.f32 %v791_v8, %v791_v8  ;;  %v795_v11 = vadd.f32 %v553_v6, %v138_v9 }
  0xce   :  { %v590_v12 = vpop.f32.mrf.mxu0 }
  0xcf   :  { %v179_v13 = vmul.f32 %v171_v10, %v791_v8  ;;  %v169_v14 = vmul.f32 %v795_v11, %v795_v11  ;;  %v800_v15 = vadd.f32 %v590_v12, %v553_v6 }
  0xd0   :  { %v141_v16 = vpop.f32.mrf.mxu0 }
  0xd1   :  { %v172_v17 = vmul.f32 %v800_v15, %v800_v15  ;;  %v804_v18 = vadd.f32 %v553_v6, %v141_v16  ;;  %v187_v19 = vmul.f32 0.044715, %v179_v13  ;;  %v177_v20 = vmul.f32 %v169_v14, %v795_v11 }
  0xd2   :  { %v593_v21 = vpop.f32.mrf.mxu0 }
  0xd3   :  { %v180_v22 = vmul.f32 %v172_v17, %v800_v15  ;;  %v170_v23 = vmul.f32 %v804_v18, %v804_v18  ;;  %v163_v24 = vadd.f32 %v593_v21, %v553_v6  ;;  %v195_v29 = vadd.f32 %v187_v19, %v791_v8 }
  0xd4   :  { %v154_v25 = vpop.f32.mrf.mxu0  ;;  %v185_v30 = vmul.f32 0.044715, %v177_v20 }
  0xd5   :  { %v188_v26 = vmul.f32 0.044715, %v180_v22  ;;  %v178_v27 = vmul.f32 %v170_v23, %v804_v18  ;;  %v155_v28 = vadd.f32 %v553_v6, %v154_v25  ;;  %v175_v31 = vmul.f32 %v163_v24, %v163_v24 }
  0xd6   :  { %v594_v32 = vpop.f32.mrf.mxu0  ;;  %v193_v42 = vadd.f32 %v185_v30, %v795_v11  ;;  %v203_v44 = vmul.f32 0.7978846, %v195_v29 }
  0xd7   :  { %v196_v33 = vadd.f32 %v188_v26, %v800_v15  ;;  %v173_v34 = vmul.f32 %v155_v28, %v155_v28  ;;  %v166_v35 = vadd.f32 %v594_v32, %v553_v6  ;;  %v186_v36 = vmul.f32 0.044715, %v178_v27 }
  0xd8   :  { %v183_v37 = vmul.f32 %v175_v31, %v163_v24  ;;  %v157_v38 = vpop.f32.mrf.mxu0  ;;  %625 = vtanh.f32 %v203_v44  ;;  %v201_v55 = vmul.f32 0.7978846, %v193_v42 }
  0xd9   :  { %v181_v39 = vmul.f32 %v173_v34, %v155_v28  ;;  %v176_v40 = vmul.f32 %v166_v35, %v166_v35  ;;  %v158_v41 = vadd.f32 %v553_v6, %v157_v38  ;;  %v204_v48 = vmul.f32 0.7978846, %v196_v33 }
  0xda   :  { %v191_v43 = vmul.f32 0.044715, %v183_v37  ;;  %v194_v49 = vadd.f32 %v186_v36, %v804_v18 }
  0xdb   :  { %v189_v45 = vmul.f32 0.044715, %v181_v39  ;;  %v184_v46 = vmul.f32 %v176_v40, %v166_v35  ;;  %v174_v47 = vmul.f32 %v158_v41, %v158_v41  ;;  %627 = vtanh.f32 %v204_v48 }
  0xdc   :  { %v199_v50 = vadd.f32 %v191_v43, %v163_v24  ;;  %v202_v59 = vmul.f32 0.7978846, %v194_v49 }
  0xdd   :  { %v197_v51 = vadd.f32 %v189_v45, %v155_v28  ;;  %v192_v52 = vmul.f32 0.044715, %v184_v46  ;;  %v182_v53 = vmul.f32 %v174_v47, %v158_v41 }
  0xde   :  { %v207_v54 = vmul.f32 0.7978846, %v199_v50 }
  0xdf   :  { %v200_v56 = vadd.f32 %v192_v52, %v166_v35  ;;  %v190_v57 = vmul.f32 0.044715, %v182_v53  ;;  %v205_v58 = vmul.f32 0.7978846, %v197_v51 }
  0xe0   :  { %629 = vtanh.f32 %v207_v54 }
  0xe1   :  { %v198_v60 = vadd.f32 %v190_v57, %v158_v41  ;;  %631 = vtanh.f32 %v205_v58  ;;  %v208_v61 = vmul.f32 0.7978846, %v200_v56 }
  0xe2   :  { %633 = vtanh.f32 %v201_v55 }
  0xe3   :  { %635 = vtanh.f32 %v208_v61  ;;  %v206_v62 = vmul.f32 0.7978846, %v198_v60 }
  0xe4   :  { %637 = vtanh.f32 %v202_v59 }
  0xe5   :  { %639 = vtanh.f32 %v206_v62  ;;  %v626_v63 = vpop.eup %625 }
  0xe6   :  { %v219_v9 = vadd.f32 1.0, %v626_v63 }
  0xe8   :  { %v628_v0 = vpop.eup %627  ;;  %v227_v23 = vmul.f32 0.5, %v219_v9 }
  0xe9   :  { %v220_v14 = vadd.f32 1.0, %v628_v0 }
  0xeb   :  { %v228_v31 = vmul.f32 0.5, %v220_v14 }
  0xed   :  { %v630_v1 = vpop.eup %629  ;;  %v236_v36 = vmul.f32 %v228_v31, %v800_v15 }
  0xee   :  { %v632_v2 = vpop.eup %631  ;;  %v223_v3 = vadd.f32 1.0, %v630_v1 }
  0xef   :  { %v634_v4 = vpop.eup %633  ;;  %v221_v5 = vadd.f32 1.0, %v632_v2  ;;  %v250_v39 = vsel %vm91_vm0, %v236_v36, 0.0 }
  0xf0   :  { %v636_v6 = vpop.eup %635  ;;  %v231_v7 = vmul.f32 0.5, %v223_v3  ;;  %v217_v25 = vadd.f32 1.0, %v634_v4 }
  0xf1   :  { %v638_v10 = vpop.eup %637  ;;  %v229_v12 = vmul.f32 0.5, %v221_v5  ;;  %v224_v13 = vadd.f32 1.0, %v636_v6 }
  0xf2   :  { %v640_v16 = vpop.eup %639  ;;  %v239_v17 = vmul.f32 %v231_v7, %v163_v24  ;;  %v218_v26 = vadd.f32 1.0, %v638_v10  ;;  %v235_v24 = vmul.f32 %v227_v23, %v791_v8  ;;  %v703_v23 = vmov 0  }
  0xf3   :  { %v237_v19 = vmul.f32 %v229_v12, %v155_v28  ;;  %v232_v20 = vmul.f32 0.5, %v224_v13  ;;  %v222_v21 = vadd.f32 1.0, %v640_v16  ;;  %v225_v28 = vmul.f32 0.5, %v217_v25  ;;  %612 = vset.pattern.permute.xlu0 %v703_v23  ;;  %v624_v25 = vld [vmem:[%s926_s8 + $0x4] ss:$8 sps:$4 sm:$0xff]   ;;  %514 = vmatprep.mubr.bf16.mxu0 %v703_v23 }
  0xf4   :  { %v259_v22 = vsel %vm91_vm0, %v239_v17, 0.0  ;;  %v226_v37 = vmul.f32 0.5, %v218_v26  ;;  %v247_v38 = vsel %vm91_vm0, %v235_v24, 0.0  ;;  %v622_v26 = vld [vmem:[%s926_s8] ss:$8 sps:$4 sm:$0xff]  }
  0xf5   :  { %260 = vadd.xlane.f32.xlu0 %v259_v22  ;;  %v253_v27 = vsel %vm91_vm0, %v237_v19, 0.0  ;;  %v240_v29 = vmul.f32 %v232_v20, %v166_v35  ;;  %v230_v30 = vmul.f32 0.5, %v222_v21  ;;  %v233_v35 = vmul.f32 %v225_v28, %v795_v11  ;;  %v434_v20 = vld [vmem:[%s921_s3] sm:$0xff]  ;;  %v619_v21 = vld [vmem:[%s926_s8 + $0x10] ss:$8 sps:$4 sm:$0xff]  }
  0xf6   :  { %254 = vadd.xlane.f32.xlu1 %v253_v27  ;;  %v234_v40 = vmul.f32 %v226_v37, %v804_v18  ;;  %v621_v22 = vld [vmem:[%s926_s8 + $0x14] ss:$8 sps:$4 sm:$0xff]  }
  0xf7   :  { %v262_v32 = vsel %vm91_vm0, %v240_v29, 0.0  ;;  %v238_v33 = vmul.f32 %v230_v30, %v158_v41  ;;  %v241_v8 = vsel %vm91_vm0, %v233_v35, 0.0  ;;  %494 = vmatprep.subr.bf16.mxu0 %v621_v22 }
  0xf8   :  { %v244_v41 = vsel %vm91_vm0, %v234_v40, 0.0  ;;  %495 = vmatpush1.bf16.msra.mxu0 %v619_v21 }
  0xf9   :  { %263 = vadd.xlane.f32.xlu0 %v262_v32  ;;  %v256_v34 = vsel %vm91_vm0, %v238_v33, 0.0  ;;  %496 = vmatprep.subr.bf16.mxu0 %v624_v25 }
  0xfa   :  { %257 = vadd.xlane.f32.xlu1 %v256_v34 }
  0xfc   :  { %497 = vmatpush1.bf16.msra.mxu0 %v622_v26 }
  0xfd   :  { %248 = vadd.xlane.f32.xlu0 %v247_v38 }
  0xfe   :  { %251 = vadd.xlane.f32.xlu1 %v250_v39 }
 0x101   :  { %242 = vadd.xlane.f32.xlu0 %v241_v8 }
 0x102   :  { %245 = vadd.xlane.f32.xlu1 %v244_v41 }
 0x17e   :  { %v261_v42 = vpop.xlane.xlu0 %260 }
 0x17f   :  { %v272_v15 = vmul.f32 0.03125, %v261_v42  ;;  %v255_v43 = vpop.xlane.xlu1 %254 }
 0x180   :  { %v270_v44 = vmul.f32 0.03125, %v255_v43 }
 0x181   :  { %v827_v45 = vsub.f32 %v239_v17, %v272_v15 }
 0x182   :  { %v829_v46 = vsub.f32 %v237_v19, %v270_v44  ;;  %v264_v11 = vpop.xlane.xlu0 %263  ;;  %v701_v19 = vmov 0.0  }
 0x183   :  { %v273_v47 = vmul.f32 0.03125, %v264_v11  ;;  %v258_v48 = vpop.xlane.xlu1 %257  ;;  %v288_v18 = vmul.f32 %v827_v45, %v827_v45  ;;  %595 = vmatprep.subr.bf16.mxu1 %v701_v19  ;;  %603 = vmatprep.mubr.msk.bf16.mxu1 %vm702_vm1, %v701_v19 }
 0x184   :  { %v271_v49 = vmul.f32 0.03125, %v258_v48  ;;  %v286_v52 = vmul.f32 %v829_v46, %v829_v46 }
 0x185   :  { %v833_v50 = vsub.f32 %v240_v29, %v273_v47  ;;  %v308_v51 = vsel %vm91_vm0, %v288_v18, 0.0 }
 0x186   :  { %v838_v53 = vsub.f32 %v238_v33, %v271_v49  ;;  %v249_v54 = vpop.xlane.xlu0 %248  ;;  %309 = vadd.xlane.f32.xlu0 %v308_v51  ;;  %v302_v61 = vsel %vm91_vm0, %v286_v52, 0.0  ;;  %v564_v51 = vld [vmem:[%s924_s6] ss:$0 sm:$0xff] }
 0x187   :  { %v268_v55 = vmul.f32 0.03125, %v249_v54  ;;  %v252_v56 = vpop.xlane.xlu1 %251  ;;  %v289_v57 = vmul.f32 %v833_v50, %v833_v50 }
 0x188   :  { %v269_v58 = vmul.f32 0.03125, %v252_v56  ;;  %v287_v62 = vmul.f32 %v838_v53, %v838_v53 }
 0x189   :  { %v842_v59 = vsub.f32 %v235_v24, %v268_v55  ;;  %v311_v60 = vsel %vm91_vm0, %v289_v57, 0.0  ;;  %v565_v57 = vld [vmem:[%s925_s7] ss:$0 sm:$0xff] }
 0x18a   :  { %v848_v63 = vsub.f32 %v236_v36, %v269_v58  ;;  %312 = vadd.xlane.f32.xlu1 %v311_v60  ;;  %303 = vadd.xlane.f32.xlu0 %v302_v61  ;;  %v243_v0 = vpop.xlane.xlu0 %242  ;;  %v305_v6 = vsel %vm91_vm0, %v287_v62, 0.0  ;;  %v385_v62 = vlaneseq }
 0x18b   :  { %v266_v1 = vmul.f32 0.03125, %v243_v0  ;;  %v246_v2 = vpop.xlane.xlu1 %245  ;;  %v284_v3 = vmul.f32 %v842_v59, %v842_v59 }
 0x18c   :  { %v267_v4 = vmul.f32 0.03125, %v246_v2  ;;  %v285_v9 = vmul.f32 %v848_v63, %v848_v63 }
 0x18d   :  { %v852_v5 = vsub.f32 %v233_v35, %v266_v1  ;;  %v296_v7 = vsel %vm91_vm0, %v284_v3, 0.0 }
 0x18e   :  { %v858_v10 = vsub.f32 %v234_v40, %v267_v4  ;;  %306 = vadd.xlane.f32.xlu1 %v305_v6  ;;  %297 = vadd.xlane.f32.xlu0 %v296_v7  ;;  %v299_v13 = vsel %vm91_vm0, %v285_v9, 0.0  ;;  %v386_v9 = vshrl.u32 %v385_v62, 7 }
 0x18f   :  { %v282_v12 = vmul.f32 %v852_v5, %v852_v5 }
 0x190   :  { %v283_v16 = vmul.f32 %v858_v10, %v858_v10  ;;  %v387_v23 = vsub.s32 0, %v386_v9 }
 0x191   :  { %v290_v14 = vsel %vm91_vm0, %v282_v12, 0.0 }
 0x192   :  { %300 = vadd.xlane.f32.xlu1 %v299_v13  ;;  %291 = vadd.xlane.f32.xlu0 %v290_v14  ;;  %v293_v17 = vsel %vm91_vm0, %v283_v16, 0.0 }
 0x196   :  { %294 = vadd.xlane.f32.xlu1 %v293_v17  ;;  %v381_v17 = vld [vmem:[%s920_s2] sm:$0x1] }
 0x197   :  { %v383_v22 = vpack.i.b16 %v381_v17, %v381_v17 }
 0x1a8   :  { %437 = vperm.xlu0 %612, %v434_v20  }
 0x20f   :  { %v310_v27 = vpop.xlane.xlu0 %309 }
 0x210   :  { %v320_v29 = vmul.f32 0.03125, %v310_v27 }
 0x212   :  { %v328_v30 = vadd.f32 1e-05, %v320_v29 }
 0x213   :  { %v313_v31 = vpop.xlane.xlu1 %312  ;;  %v304_v32 = vpop.xlane.xlu0 %303 }
 0x214   :  { %641 = vrsqrt.f32 %v328_v30  ;;  %v321_v33 = vmul.f32 0.03125, %v313_v31  ;;  %v318_v24 = vmul.f32 0.03125, %v304_v32  ;;  %v388_v31 = vrot.slane %v383_v22, %v387_v23 }
 0x216   :  { %v329_v28 = vadd.f32 1e-05, %v321_v33  ;;  %v326_v34 = vadd.f32 1e-05, %v318_v24 }
 0x217   :  { %v307_v36 = vpop.xlane.xlu1 %306  ;;  %v298_v37 = vpop.xlane.xlu0 %297 }
 0x218   :  { %643 = vrsqrt.f32 %v329_v28  ;;  %v319_v38 = vmul.f32 0.03125, %v307_v36  ;;  %v316_v35 = vmul.f32 0.03125, %v298_v37 }
 0x219   :  { %645 = vrsqrt.f32 %v326_v34 }
 0x21a   :  { %v327_v39 = vadd.f32 1e-05, %v319_v38  ;;  %v324_v40 = vadd.f32 1e-05, %v316_v35 }
 0x21b   :  { %v301_v8 = vpop.xlane.xlu1 %300  ;;  %v292_v41 = vpop.xlane.xlu0 %291 }
 0x21c   :  { %647 = vrsqrt.f32 %v327_v39  ;;  %v317_v42 = vmul.f32 0.03125, %v301_v8  ;;  %v314_v15 = vmul.f32 0.03125, %v292_v41 }
 0x21d   :  { %649 = vrsqrt.f32 %v324_v40 }
 0x21e   :  { %v325_v43 = vadd.f32 1e-05, %v317_v42  ;;  %v322_v44 = vadd.f32 1e-05, %v314_v15 }
 0x21f   :  { %v295_v11 = vpop.xlane.xlu1 %294 }
 0x220   :  { %651 = vrsqrt.f32 %v325_v43  ;;  %v315_v47 = vmul.f32 0.03125, %v295_v11 }
 0x221   :  { %v642_v48 = vpop.eup %641  ;;  %653 = vrsqrt.f32 %v322_v44 }
 0x222   :  { %v323_v18 = vadd.f32 1e-05, %v315_v47  ;;  %v344_v49 = vmul.f32 %v642_v48, %v827_v45 }
 0x224   :  { %655 = vrsqrt.f32 %v323_v18  ;;  %v359_v56 = vmul.f32 %v564_v51, %v344_v49 }
 0x225   :  { %v644_v52 = vpop.eup %643 }
 0x226   :  { %v646_v54 = vpop.eup %645  ;;  %v345_v55 = vmul.f32 %v644_v52, %v833_v50  ;;  %v374_v0 = vadd.f32 %v565_v57, %v359_v56 }
 0x227   :  { %v342_v58 = vmul.f32 %v646_v54, %v829_v46 }
 0x228   :  { %v360_v60 = vmul.f32 %v564_v51, %v345_v55 }
 0x229   :  { %v648_v61 = vpop.eup %647  ;;  %v357_v3 = vmul.f32 %v564_v51, %v342_v58 }
 0x22a   :  { %v650_v45 = vpop.eup %649  ;;  %v375_v1 = vadd.f32 %v565_v57, %v360_v60  ;;  %v343_v2 = vmul.f32 %v648_v61, %v838_v53 }
 0x22b   :  { %v340_v4 = vmul.f32 %v650_v45, %v842_v59  ;;  %v372_v13 = vadd.f32 %v565_v57, %v357_v3 }
 0x22c   :  { %v379_v6 = vpack.c.bf16 %v375_v1, %v374_v0  ;;  %v358_v50 = vmul.f32 %v564_v51, %v343_v2 }
 0x22d   :  { %v652_v7 = vpop.eup %651  ;;  %v355_v16 = vmul.f32 %v564_v51, %v340_v4 }
 0x22e   :  { %v654_v12 = vpop.eup %653  ;;  %596 = vmatpush3.bf16.msra.mxu1 %v379_v6  ;;  %v373_v14 = vadd.f32 %v565_v57, %v358_v50  ;;  %v341_v46 = vmul.f32 %v652_v7, %v848_v63 }
 0x22f   :  { %597 = vmatprep.subr.bf16.mxu1 %v701_v19  ;;  %v338_v53 = vmul.f32 %v654_v12, %v852_v5  ;;  %v370_v25 = vadd.f32 %v565_v57, %v355_v16  ;;  %v380_v5 = vld [vmem:[%s919_s1] sm:$0xf]  ;;  %s531_s1 = sshll.u32 %s704_s22, 4  ;;  %s532_s1 = int_to_ptr.vmem [resolvable:$true] %s531_s1 }
 0x230   :  { %v378_v59 = vpack.c.bf16 %v373_v14, %v372_v13  ;;  %v356_v20 = vmul.f32 %v564_v51, %v341_v46  ;;  %v389_v28 = vmul.bf16 %v388_v31, %v380_v5  ;;  %s657_s23 = scalar_lea.vmem %s532_s1, 128  ;;  %p662_p1 = scmp.lt.s32.totalorder %s532_s1, %s532_s1 }
 0x231   :  { %v656_v21 = vpop.eup %655  ;;  %v353_v63 = vmul.f32 %v564_v51, %v338_v53  ;;  %p658_p0 = scmp.ne.s32.totalorder %s532_s1, %s657_s23  ;;  %p663_p2 = scmp.lt.s32.totalorder %s657_s23, %s657_s23 }
 0x232   :  { %598 = vmatpush3.bf16.msra.mxu1 %v378_v59  ;;  %v371_v26 = vadd.f32 %v565_v57, %v356_v20  ;;  %v339_v27 = vmul.f32 %v656_v21, %v858_v10  ;;  %v438_v10 = vpop.permute.xlu0 %437 }
 0x233   :  { %599 = vmatprep.subr.bf16.mxu1 %v701_v19  ;;  %v368_v32 = vadd.f32 %v565_v57, %v353_v63  ;;  %p664_p3 = por %p663_p2, %p662_p1 }
 0x234   :  { %v377_v29 = vpack.c.bf16 %v371_v26, %v370_v25  ;;  %v354_v30 = vmul.f32 %v564_v51, %v339_v27 }
 0x235   :  { %p665_p4 = pnand %p664_p3, %p658_p0 }
 0x236   :  { %600 = vmatpush3.bf16.msra.mxu1 %v377_v29  ;;  %v369_v33 = vadd.f32 %v565_v57, %v354_v30 }
 0x237   :  { %601 = vmatprep.subr.bf16.mxu1 %v701_v19 }
 0x238   :  { %v376_v24 = vpack.c.bf16 %v369_v33, %v368_v32 }
 0x23a   :  { %602 = vmatpush3.bf16.msra.mxu1 %v376_v24 }
 0x23d   :  { %604 = vmatmul.mubr.msk.bf16.vlgmr.msra.gmra.mxu1 %vm390_vm2, %v389_v28 }
 0x2fd   :  { %v428_v34 = vpop.f32.mrf.mxu1 }
 0x2fe   :  { %v440_v36 = vmul.f32 %v438_v10, %v428_v34 }
 0x2ff   :  { %v605_v37 = vpop.f32.mrf.mxu1 }
 0x300   :  { %v442_v38 = vpack.c.bf16 %v440_v36, %v440_v36  ;;  %441 = vst.msk [vmem:[#allocation2] sm:$0xff] %vm91_vm0, %v440_v36 }
 0x301   :  { %v431_v35 = vpop.f32.mrf.mxu1 }
 0x302   :  { %571 = vmatmul.mubr.msk.bf16.vlgmr.msra.gmra.mxu0 %vm91_vm0, %v442_v38 }
 0x303   :  { %v606_v39 = vpop.f32.mrf.mxu1 }
 0x304   :  { %668 = shalt.err (!%p665_p4)
}
 0x305   :  { %534 = dma.vmem_to_hbm [thread:$0]  %s532_s1, 128, %s928_s10, [#allocation3]   ;;  %v447_v19 = vld [vmem:[%s927_s9] sm:$0x3]  ;;  %v455_v40 = vsub.s32 1, %v386_v9 }
 0x306   :  { %v452_v8 = vrot.slane %v447_v19, %v387_v23  ;;  %s705_s27 = smov [#allocation4]  }
 0x307   :  { %v456_v41 = vrot.slane %v447_v19, %v455_v40  ;;  %s541_s28 = sshll.u32 %s705_s27, 4  ;;  %s542_s28 = int_to_ptr.vmem [resolvable:$true] %s541_s28 }
 0x308   :  { %s677_s29 = scalar_lea.vmem %s542_s28, 256  ;;  %p682_p6 = scmp.lt.s32.totalorder %s542_s28, %s542_s28 }
 0x309   :  { %p678_p5 = scmp.ne.s32.totalorder %s542_s28, %s677_s29  ;;  %p683_p7 = scmp.lt.s32.totalorder %s677_s29, %s677_s29 }
 0x30b   :  { %p684_p8 = por %p683_p7, %p682_p6 }
 0x30d   :  { %p685_p9 = pnand %p684_p8, %p678_p5 }
 0x3c2   :  { %v516_v42 = vpop.f32.mrf.mxu0 }
 0x3c3   :  { %v517_v15 = vadd.f32 %v516_v42, %v452_v8 }
 0x3c4   :  { %v518_v43 = vpop.f32.mrf.mxu0 }
 0x3c5   :  { %523 = vst [vmem:[#allocation4] sm:$0xff] %v517_v15  ;;  %v519_v44 = vadd.f32 %v518_v43, %v456_v41 }
 0x3c6   :  { %v520_v11 = vpop.f32.mrf.mxu0 }
 0x3c7   :  { %524 = vst [vmem:[#allocation4 + $0x8] sm:$0xff] %v519_v44 }
 0x3c8   :  { %v521_v47 = vpop.f32.mrf.mxu0 }
 0x3c9   :  { %688 = shalt.err (!%p685_p9)
}
 0x3ca   :  { %544 = dma.vmem_to_hbm [thread:$0]  %s542_s28, 256, %s929_s11, [#allocation5]  }
 0x3cb   :  { %697 = dma.done.wait [#allocation3], 128  }
 0x3cc   :  { %698 = vsyncadd [#allocation3], 4294967168 }
 0x3cd   :  { %699 = dma.done.wait [#allocation5], 256  }
 0x3ce   :  { %700 = vsyncadd [#allocation5], 4294967040 }
 0x3cf   :  { %551 = vsyncpa [#allocation3], 1 }
 0x3d0   :  { %552 = vsyncpa [#allocation5], 1 }

</bundles_post_ra>
